<compile_context>
chip_gen: v7x
topology: tpu7x:2x2x1
jax: 0.10.0
libtpu: 0.0.40
codegen_flags: <defaults>
</compile_context>

<pallas_src>
import jax
import jax.numpy as jnp
from jax.experimental import pallas as pl
from jax.experimental.pallas import tpu as pltpu

STATE_N = 3                    # gym Pendulum-v0 observation dim
ACTION_N = 1                   # gym Pendulum-v0 action dim
D_IN = STATE_N + ACTION_N      # 4
HIDDEN = 84                    # logical hidden width (PyTorch module)
HPAD = 128                     # padded hidden width (one full lane tile)
KPAD = 16                      # padded fc1 contraction dim (s,a,1 -> 16), bf16-native


def _round_up(x, m):
    return (x + m - 1) // m * m


def _critic_kernel(xt_ref, w1t_ref, w2t_ref, w3t_ref, b2_ref, b3_ref, out_ref):
    # xt_ref : (KPAD, TB) bf16   rows 0..3 = [s|a]^T, row 4 = 1 (fc1 bias), rest 0
    # w1t_ref: (HPAD, KPAD) bf16 cols 0..3 = W1^T, col 4 = b1, rest 0
    # w2t_ref: (HPAD, HPAD) bf16 W2^T (zero-padded 84 -> 128)
    # w3t_ref: (KPAD, HPAD) bf16 row 0 = W3^T, rest 0
    # b2_ref : (HPAD, 1)  f32    b3_ref: (1, 1) f32 scalar in SMEM
    # out_ref: (1, TB)    f32    lane-dense Q-value row

    # fc1 (+ folded bias): bf16 MXU pass, f32 accumulate; ReLU in f32 on the VPU.
    h1 = jnp.dot(w1t_ref[...], xt_ref[...], preferred_element_type=jnp.float32)
    h1 = jnp.maximum(h1, 0.0).astype(jnp.bfloat16)       # cast only at MXU boundary

    # fc2: one aligned 128x128 bf16 MXU pass; bias (lane broadcast) + ReLU in f32.
    h2 = jnp.dot(w2t_ref[...], h1, preferred_element_type=jnp.float32)
    h2 = jnp.maximum(h2 + b2_ref[...], 0.0).astype(jnp.bfloat16)

    # fc3: tiny (KPAD x 128) MXU pass -> result already lane-dense; row 0 is live.
    q = jnp.dot(w3t_ref[...], h2, preferred_element_type=jnp.float32)
    out_ref[...] = q[0:1, :] + b3_ref[0, 0]


def pack_params(params):
    """Repack logical (in,out)-layout f32 params for the transposed bf16 kernel.
    Zero-padding 84 -> 128 keeps numerics identical (padded units stay 0)."""
    w1, b1, w2, b2, w3, b3 = params
    ph = HPAD - HIDDEN

    w1t = jnp.zeros((HPAD, KPAD), jnp.float32)
    w1t = w1t.at[:HIDDEN, :D_IN].set(w1.T.astype(jnp.float32))
    w1t = w1t.at[:HIDDEN, D_IN].set(b1.astype(jnp.float32))     # folded fc1 bias
    w1t = w1t.astype(jnp.bfloat16)                               # (HPAD, KPAD)

    w2t = jnp.pad(w2.T.astype(jnp.float32),
                  ((0, ph), (0, ph))).astype(jnp.bfloat16)       # (HPAD, HPAD)

    w3t = jnp.zeros((KPAD, HPAD), jnp.float32)
    w3t = w3t.at[0, :HIDDEN].set(w3[:, 0].astype(jnp.float32))
    w3t = w3t.astype(jnp.bfloat16)                               # (KPAD, HPAD)

    b2c = jnp.pad(b2.astype(jnp.float32), (0, ph)).reshape(HPAD, 1)
    b3s = jnp.reshape(b3, (1, 1)).astype(jnp.float32)
    return w1t, w2t, w3t, b2c, b3s


def critic_forward(s, a, packed_params, *, tile_b=2048):
    """s: (B, STATE_N) f32, a: (B, ACTION_N) f32 -> (B, 1) f32."""
    w1t, w2t, w3t, b2c, b3s = packed_params
    B = s.shape[0]

    # fc1 RHS built once in the wrapper: [s | a | 1 | 0...]^T, batch on the lane
    # axis.  The "1" row carries the folded fc1 bias.
    ones = jnp.ones((B, 1), jnp.float32)
    x = jnp.concatenate([s.astype(jnp.float32), a.astype(jnp.float32), ones], axis=1)

    # Batch (lane) tiling: tile_b lanes per grid step.
    bp0 = _round_up(B, 128)
    tb = _round_up(max(128, min(int(tile_b), 4096)), 128)
    if bp0 >= 256:
        # keep >= 2 grid steps so ("parallel",) can shard across v7x's two TCs
        tb = min(tb, _round_up((bp0 + 1) // 2, 128))
    else:
        tb = 128
    bp = _round_up(bp0, tb)

    x = jnp.pad(x, ((0, bp - B), (0, KPAD - x.shape[1])))
    xt = x.astype(jnp.bfloat16).T                      # (KPAD, bp), batch in lanes

    out = pl.pallas_call(
        _critic_kernel,
        out_shape=jax.ShapeDtypeStruct((1, bp), jnp.float32),
        grid_spec=pltpu.PrefetchScalarGridSpec(
            num_scalar_prefetch=0,
            grid=(bp // tb,),
            in_specs=[
                pl.BlockSpec((KPAD, tb), lambda i: (0, i)),        # x^T tile
                pl.BlockSpec((HPAD, KPAD), lambda i: (0, 0)),      # W1^T|b1 (resident)
                pl.BlockSpec((HPAD, HPAD), lambda i: (0, 0)),      # W2^T (resident)
                pl.BlockSpec((KPAD, HPAD), lambda i: (0, 0)),      # W3^T (resident)
                pl.BlockSpec((HPAD, 1), lambda i: (0, 0)),         # b2 column (resident)
                pl.BlockSpec(memory_space=pltpu.MemorySpace.SMEM), # b3 scalar
            ],
            out_specs=pl.BlockSpec((1, tb), lambda i: (0, i)),     # lane-dense row
        ),
        compiler_params=pltpu.CompilerParams(
            dimension_semantics=("parallel",),
            vmem_limit_bytes=32 * 1024 * 1024,
        ),
    )(xt, w1t, w2t, w3t, b2c, b3s)
    return out[0, :B].reshape(B, 1)


def init_params(key):
    """Deterministic synthetic params at LOGICAL shapes (layout: (in, out))."""
    k1, k2, k3, k4, k5, k6 = jax.random.split(key, 6)

    def u(k, shape, fan_in):
        bound = 1.0 / jnp.sqrt(fan_in)
        return jax.random.uniform(k, shape, jnp.float32, -bound, bound)

    w1 = u(k1, (D_IN, HIDDEN), D_IN)
    b1 = u(k2, (HIDDEN,), D_IN)
    w2 = u(k3, (HIDDEN, HIDDEN), HIDDEN)
    b2 = u(k4, (HIDDEN,), HIDDEN)
    w3 = u(k5, (HIDDEN, 1), HIDDEN)
    b3 = u(k6, (1,), HIDDEN)
    return (w1, b1, w2, b2, w3, b3)


def critic_reference(s, a, params):
    """Pure-JAX f32 reference of the PyTorch forward pass (logical params)."""
    w1, b1, w2, b2, w3, b3 = params
    x = jnp.concatenate([s, a], axis=1)
    x = jax.nn.relu(x @ w1 + b1)
    x = jax.nn.relu(x @ w2 + b2)
    return x @ w3 + b3


if __name__ == "__main__":
    key = jax.random.PRNGKey(0)
    kp, ks, ka = jax.random.split(key, 3)

    params = init_params(kp)
    packed = pack_params(params)

    # Small single-tile case.
    B = 8
    s = jax.random.normal(ks, (B, STATE_N), jnp.float32)
    a = jax.random.normal(ka, (B, ACTION_N), jnp.float32)
    out = jax.block_until_ready(critic_forward(s, a, packed))
    ref = critic_reference(s, a, params)
    assert out.shape == (B, 1)
    # bf16 MXU operands (f32 accumulate) -> tolerance relaxed vs. pure f32.
    assert jnp.allclose(out, ref, atol=2e-2, rtol=2e-2), (
        f"max abs err {jnp.max(jnp.abs(out - ref))}")

    # Multi-tile ("parallel" grid) + batch-padding path.
    B2 = 300
    ks2, ka2 = jax.random.split(jax.random.PRNGKey(1), 2)
    s2 = jax.random.normal(ks2, (B2, STATE_N), jnp.float32)
    a2 = jax.random.normal(ka2, (B2, ACTION_N), jnp.float32)
    out2 = jax.block_until_ready(critic_forward(s2, a2, packed))
    ref2 = critic_reference(s2, a2, params)
    assert out2.shape == (B2, 1)
    assert jnp.allclose(out2, ref2, atol=2e-2, rtol=2e-2), (
        f"max abs err {jnp.max(jnp.abs(out2 - ref2))}")

    print("KERNEL_OK")
</pallas_src>

<mosaic_0001>
module attributes {stable_mosaic.version = 11 : i64} {
  func.func @_critic_kernel(%arg0: i32, %arg1: memref<16x128xbf16, #tpu.memory_space<vmem>>, %arg2: memref<128x16xbf16, #tpu.memory_space<vmem>>, %arg3: memref<128x128xbf16, #tpu.memory_space<vmem>>, %arg4: memref<16x128xbf16, #tpu.memory_space<vmem>>, %arg5: memref<128x1xf32, #tpu.memory_space<vmem>>, %arg6: memref<1x1xf32, #tpu.memory_space<smem>>, %arg7: memref<1x128xf32, #tpu.memory_space<vmem>>) attributes {dimension_semantics = [#tpu.dimension_semantics<parallel>], iteration_bounds = array<i64: 1>, scalar_prefetch = 0 : i64, scratch_operands = 0 : i64, tpu.core_type = #tpu.core_type<tc>, window_params = [{transform_indices = @transform_0, window_bounds = array<i64: 16, 128>}, {pipeline_mode = #tpu.pipeline_mode<synchronous>, transform_indices = @transform_1, window_bounds = array<i64: 128, 16>}, {pipeline_mode = #tpu.pipeline_mode<synchronous>, transform_indices = @transform_2, window_bounds = array<i64: 128, 128>}, {pipeline_mode = #tpu.pipeline_mode<synchronous>, transform_indices = @transform_3, window_bounds = array<i64: 16, 128>}, {pipeline_mode = #tpu.pipeline_mode<synchronous>, transform_indices = @transform_4, window_bounds = array<i64: 128, 1>}, {transform_indices = @transform_5, window_bounds = array<i64: 1, 1>}, {transform_indices = @transform_6, window_bounds = array<i64: 1, 128>}]} {
    %c0 = arith.constant 0 : index
    %c0_0 = arith.constant 0 : index
    %0 = vector.load %arg2[%c0, %c0_0] : memref<128x16xbf16, #tpu.memory_space<vmem>>, vector<128x16xbf16>
    %c0_1 = arith.constant 0 : index
    %c0_2 = arith.constant 0 : index
    %1 = vector.load %arg1[%c0_1, %c0_2] : memref<16x128xbf16, #tpu.memory_space<vmem>>, vector<16x128xbf16>
    %cst = arith.constant dense<0.000000e+00> : vector<128x128xf32>
    %2 = tpu.matmul %0, %1, %cst {dimension_numbers = #tpu.dot_dimension_numbers<[1], [0], [0], [1], [0, 0, 1, 1], [], []>} : vector<128x16xbf16>, vector<16x128xbf16>, vector<128x128xf32> -> vector<128x128xf32>
    %cst_3 = arith.constant 0.000000e+00 : f32
    %3 = vector.broadcast %cst_3 : f32 to vector<128x128xf32>
    %4 = arith.maximumf %2, %3 : vector<128x128xf32>
    %5 = arith.truncf %4 : vector<128x128xf32> to vector<128x128xbf16>
    %c0_4 = arith.constant 0 : index
    %c0_5 = arith.constant 0 : index
    %6 = vector.load %arg3[%c0_4, %c0_5] : memref<128x128xbf16, #tpu.memory_space<vmem>>, vector<128x128xbf16>
    %cst_6 = arith.constant dense<0.000000e+00> : vector<128x128xf32>
    %7 = tpu.matmul %6, %5, %cst_6 {dimension_numbers = #tpu.dot_dimension_numbers<[1], [0], [0], [1], [0, 0, 1, 1], [], []>} : vector<128x128xbf16>, vector<128x128xbf16>, vector<128x128xf32> -> vector<128x128xf32>
    %c0_7 = arith.constant 0 : index
    %c0_8 = arith.constant 0 : index
    %8 = vector.load %arg5[%c0_7, %c0_8] : memref<128x1xf32, #tpu.memory_space<vmem>>, vector<128x1xf32>
    %9 = vector.broadcast %8 : vector<128x1xf32> to vector<128x128xf32>
    %10 = arith.addf %7, %9 : vector<128x128xf32>
    %cst_9 = arith.constant 0.000000e+00 : f32
    %11 = vector.broadcast %cst_9 : f32 to vector<128x128xf32>
    %12 = arith.maximumf %10, %11 : vector<128x128xf32>
    %13 = arith.truncf %12 : vector<128x128xf32> to vector<128x128xbf16>
    %c0_10 = arith.constant 0 : index
    %c0_11 = arith.constant 0 : index
    %14 = vector.load %arg4[%c0_10, %c0_11] : memref<16x128xbf16, #tpu.memory_space<vmem>>, vector<16x128xbf16>
    %cst_12 = arith.constant dense<0.000000e+00> : vector<16x128xf32>
    %15 = tpu.matmul %14, %13, %cst_12 {dimension_numbers = #tpu.dot_dimension_numbers<[1], [0], [0], [1], [0, 0, 1, 1], [], []>} : vector<16x128xbf16>, vector<128x128xbf16>, vector<16x128xf32> -> vector<16x128xf32>
    %16 = vector.extract_strided_slice %15 {offsets = [0, 0], sizes = [1, 128], strides = [1, 1]} : vector<16x128xf32> to vector<1x128xf32>
    %c0_13 = arith.constant 0 : index
    %c0_14 = arith.constant 0 : index
    %17 = memref.load %arg6[%c0_13, %c0_14] : memref<1x1xf32, #tpu.memory_space<smem>>
    %18 = vector.broadcast %17 : f32 to vector<1x128xf32>
    %19 = arith.addf %16, %18 : vector<1x128xf32>
    %c0_15 = arith.constant 0 : index
    %c0_16 = arith.constant 0 : index
    %20 = vector.load %arg7[%c0_15, %c0_16] : memref<1x128xf32, #tpu.memory_space<vmem>>, vector<1x128xf32>
    tpu.vector_store %arg7[%c0_15, %c0_16], %19 {strides = array<i32>} : memref<1x128xf32, #tpu.memory_space<vmem>>, vector<1x128xf32>,
    return
  }
  func.func @transform_0(%arg0: i32) -> (i32, i32) {
    %c0_i32 = arith.constant 0 : i32
    %c0_i32_0 = arith.constant 0 : i32
    return %c0_i32, %arg0 : i32, i32
  }
  func.func @transform_1(%arg0: i32) -> (i32, i32) {
    %c0_i32 = arith.constant 0 : i32
    %c0_i32_0 = arith.constant 0 : i32
    %c0_i32_1 = arith.constant 0 : i32
    return %c0_i32, %c0_i32_0 : i32, i32
  }
  func.func @transform_2(%arg0: i32) -> (i32, i32) {
    %c0_i32 = arith.constant 0 : i32
    %c0_i32_0 = arith.constant 0 : i32
    %c0_i32_1 = arith.constant 0 : i32
    return %c0_i32, %c0_i32_0 : i32, i32
  }
  func.func @transform_3(%arg0: i32) -> (i32, i32) {
    %c0_i32 = arith.constant 0 : i32
    %c0_i32_0 = arith.constant 0 : i32
    %c0_i32_1 = arith.constant 0 : i32
    return %c0_i32, %c0_i32_0 : i32, i32
  }
  func.func @transform_4(%arg0: i32) -> (i32, i32) {
    %c0_i32 = arith.constant 0 : i32
    %c0_i32_0 = arith.constant 0 : i32
    %c0_i32_1 = arith.constant 0 : i32
    return %c0_i32, %c0_i32_0 : i32, i32
  }
  func.func @transform_5(%arg0: i32) -> (i32, i32) {
    %c0_i32 = arith.constant 0 : i32
    %c0_i32_0 = arith.constant 0 : i32
    %c0_i32_1 = arith.constant 0 : i32
    return %c0_i32, %c0_i32_0 : i32, i32
  }
  func.func @transform_6(%arg0: i32) -> (i32, i32) {
    %c0_i32 = arith.constant 0 : i32
    %c0_i32_0 = arith.constant 0 : i32
    return %c0_i32, %arg0 : i32, i32
  }
}

</mosaic_0001>

<bundles_post_ra>
// kernel: tpu_custom_call.1
= control target key start
LH: loop header
LB: loop body
LE: loop exit
PB: predicated region body
PF: predicated region fallthrough
CT: control target
= control target key end

     0   :  { %vm90_vm0 = vcmask 130048   ;;  %s934_s0 = inlined_call_operand.vmem [shape: bf16[16,128], index: 0, kind: input, shape index: {}]   ;;  %s935_s1 = inlined_call_operand.vmem [shape: bf16[128,16], index: 1, kind: input, shape index: {}]   ;;  %s936_s2 = inlined_call_operand.vmem [shape: bf16[128,128], index: 2, kind: input, shape index: {}]   ;;  %s937_s3 = inlined_call_operand.vmem [shape: bf16[16,128], index: 3, kind: input, shape index: {}]   ;;  %s938_s4 = inlined_call_operand.vmem [shape: f32[128,1], index: 4, kind: input, shape index: {}]   ;;  %s939_s5 = inlined_call_operand.<no memory space> [shape: f32[1,1], index: 5, kind: input, shape index: {}]   ;;  %s940_s6 = inlined_call_operand.hbm [shape: f32[1,128], index: 6, kind: output, shape index: {}]  }
   0x1   :  { %v719_v0 = vld [vmem:[%s934_s0] sm:$0xff]   ;;  %v721_v2 = vld [vmem:[%s935_s1 + $0x8] sm:$0xff]   ;;  %v722_v3 = vld [vmem:[%s935_s1 + $0x10] sm:$0xff]  }
   0x2   :  { %v720_v1 = vld [vmem:[%s935_s1] sm:$0xff]   ;;  %643 = vmatprep.subr.bf16.mxu0 %v719_v0  ;;  %v723_v4 = vld [vmem:[%s935_s1 + $0x18] sm:$0xff]  }
   0x3   :  { %644 = vmatpush3.bf16.msra.mxu0 %v719_v0  ;;  %645 = vmatprep.mubr.msk.bf16.mxu0 %vm90_vm0, %v720_v1  ;;  %v724_v5 = vld [vmem:[%s935_s1 + $0x20] sm:$0xff]  }
   0x6   :  { %646 = vmatmul.mubr.msk.bf16.vlgmr.msra.gmra.mrb[0].mxu0 %vm90_vm0, %v721_v2 }
   0x7   :  { %649 = vmatprep.mubr.msk.bf16.mxu0 %vm90_vm0, %v722_v3 }
   0xe   :  { %650 = vmatmul.mubr.msk.bf16.gmra.mrb[4].mxu0 %vm90_vm0, %v723_v4 }
   0xf   :  { %653 = vmatprep.mubr.msk.bf16.mxu0 %vm90_vm0, %v724_v5 }
  0x10   :  { %12 = vsyncpa [#allocation4], 0  ;;  %v725_v6 = vld [vmem:[%s935_s1 + $0x28] sm:$0xff]   ;;  %v726_v7 = vld [vmem:[%s935_s1 + $0x30] sm:$0xff]   ;;  %v761_v12 = vmov 0   ;;  %vm763_vm1 = vmmov 0  }
  0x11   :  { %v727_v8 = vld [vmem:[%s935_s1 + $0x38] sm:$0xff]   ;;  %v728_v9 = vld [vmem:[%s936_s2] sm:$0xff]   ;;  %v254_v11 = vld [vmem:[%s938_s4 + $0x10] sm:$0xff]  ;;  %717 = vset.pattern.permute.xlu0 %v761_v12  ;;  %718 = vset.pattern.permute.xlu1 %v761_v12  ;;  %s764_s12 = smov [#allocation3]  }
  0x12   :  { %677 = vmatprep.mubr.bf16.mxu1 %v728_v9  ;;  %v252_v10 = vld [vmem:[%s938_s4] sm:$0xff]  ;;  %280 = vperm.xlu1 %718, %v254_v11   ;;  %v253_v13 = vld [vmem:[%s938_s4 + $0x8] sm:$0xff]  ;;  %v255_v14 = vld [vmem:[%s938_s4 + $0x18] sm:$0xff]  ;;  %s575_s13 = sshll.u32 %s764_s12, 4  ;;  %s576_s13 = int_to_ptr.vmem [resolvable:$true] %s575_s13 }
  0x13   :  { %270 = vperm.xlu0 %717, %v252_v10   ;;  %v256_v15 = vld [vmem:[%s938_s4 + $0x20] sm:$0xff]  ;;  %v257_v16 = vld [vmem:[%s938_s4 + $0x28] sm:$0xff]  ;;  %v258_v17 = vld [vmem:[%s938_s4 + $0x30] sm:$0xff]  ;;  %v762_v10 = vmov 0.0   ;;  %s737_s14 = scalar_lea.vmem %s576_s13, 16  ;;  %s741_s15 = scalar_lea.vmem %s576_s13, 32 }
  0x14   :  { %v259_v18 = vld [vmem:[%s938_s4 + $0x38] sm:$0xff]  ;;  %v260_v19 = vld [vmem:[%s938_s4 + $0x40] sm:$0xff]  ;;  %v261_v20 = vld [vmem:[%s938_s4 + $0x48] sm:$0xff]  ;;  %693 = vmatprep.subr.bf16.mxu0 %v762_v10  ;;  %p738_p0 = scmp.ne.s32.totalorder %s576_s13, %s737_s14  ;;  %p742_p1 = scmp.lt.s32.totalorder %s576_s13, %s576_s13 }
  0x15   :  { %v262_v21 = vld [vmem:[%s938_s4 + $0x50] sm:$0xff]  ;;  %v263_v22 = vld [vmem:[%s938_s4 + $0x58] sm:$0xff]  ;;  %v264_v23 = vld [vmem:[%s938_s4 + $0x60] sm:$0xff]  ;;  %p743_p2 = scmp.lt.s32.totalorder %s741_s15, %s737_s14 }
  0x16   :  { %654 = vmatmul.mubr.msk.bf16.gmra.mrb[8].mxu0 %vm90_vm0, %v725_v6  ;;  %285 = vperm.xlu1 %718, %v255_v14   ;;  %v265_v24 = vld [vmem:[%s938_s4 + $0x68] sm:$0xff]  ;;  %v266_v25 = vld [vmem:[%s938_s4 + $0x70] sm:$0xff]  ;;  %v267_v26 = vld [vmem:[%s938_s4 + $0x78] sm:$0xff] }
  0x17   :  { %657 = vmatprep.mubr.msk.bf16.mxu0 %vm90_vm0, %v726_v7  ;;  %275 = vperm.xlu0 %717, %v253_v13   ;;  %v729_v3 = vld [vmem:[%s936_s2 + $0x8] sm:$0xff]   ;;  %v730_v4 = vld [vmem:[%s936_s2 + $0x10] sm:$0xff]   ;;  %v731_v5 = vld [vmem:[%s936_s2 + $0x18] sm:$0xff]   ;;  %p744_p3 = por %p743_p2, %p742_p1 }
  0x18   :  { %v732_v6 = vld [vmem:[%s936_s2 + $0x20] sm:$0xff]   ;;  %v733_v7 = vld [vmem:[%s936_s2 + $0x28] sm:$0xff]   ;;  %v735_v9 = vld [vmem:[%s936_s2 + $0x38] sm:$0xff]  }
  0x19   :  { %p745_p4 = pnand %p744_p3, %p738_p0 }
  0x1a   :  { %295 = vperm.xlu1 %718, %v257_v16  }
  0x1b   :  { %290 = vperm.xlu0 %717, %v256_v15  }
  0x1e   :  { %658 = vmatmul.mubr.msk.bf16.gmra.mrb[12].mxu0 %vm90_vm0, %v727_v8  ;;  %305 = vperm.xlu1 %718, %v259_v18   ;;  %v734_v8 = vld [vmem:[%s936_s2 + $0x30] sm:$0xff]  }
  0x1f   :  { %300 = vperm.xlu0 %717, %v258_v17   ;;  %709 = vmatprep.mubr.msk.bf16.mxu0 %vm763_vm1, %v762_v10 }
  0x22   :  { %315 = vperm.xlu1 %718, %v261_v20  }
  0x23   :  { %310 = vperm.xlu0 %717, %v260_v19  }
  0x26   :  { %325 = vperm.xlu1 %718, %v263_v22  }
  0x27   :  { %320 = vperm.xlu0 %717, %v262_v21  }
  0x2a   :  { %335 = vperm.xlu1 %718, %v265_v24  }
  0x2b   :  { %330 = vperm.xlu0 %717, %v264_v23  }
  0x2e   :  { %345 = vperm.xlu1 %718, %v267_v26  }
  0x2f   :  { %340 = vperm.xlu0 %717, %v266_v25  }
  0x91   :  { %v281_v12 = vpop.permute.xlu1 %280 }
  0x92   :  { %v271_v11 = vpop.permute.xlu0 %270 }
  0x95   :  { %v286_v14 = vpop.permute.xlu1 %285 }
  0x96   :  { %v276_v13 = vpop.permute.xlu0 %275 }
  0x99   :  { %v296_v16 = vpop.permute.xlu1 %295 }
  0x9a   :  { %v291_v15 = vpop.permute.xlu0 %290 }
  0x9d   :  { %v306_v21 = vpop.permute.xlu1 %305 }
  0x9e   :  { %v301_v17 = vpop.permute.xlu0 %300 }
  0xd9   :  { %v647_v27 = vpop.f32.mrb[0].mxu0 }
  0xda   :  { %v149_v28 = vpop.f32.mrb[1].mxu0  ;;  %v214_v30 = vmax.f32 %v647_v27, 0.0 }
  0xdb   :  { %v648_v29 = vpop.f32.mrb[2].mxu0  ;;  %v212_v33 = vmax.f32 %v149_v28, 0.0 }
  0xdc   :  { %v215_v31 = vmax.f32 %v648_v29, 0.0  ;;  %v152_v32 = vpop.f32.mrb[3].mxu0  ;;  %v311_v29 = vpop.permute.xlu0 %310 }
  0xdd   :  { %v213_v34 = vmax.f32 %v152_v32, 0.0 }
  0xde   :  { %v229_v35 = vpack.c.bf16 %v215_v31, %v214_v30 }
  0xdf   :  { %v228_v36 = vpack.c.bf16 %v213_v34, %v212_v33  ;;  %v316_v33 = vpop.permute.xlu1 %315 }
  0xe1   :  { %v651_v37 = vpop.f32.mrb[4].mxu0  ;;  %661 = vmatprep.subr.bf16.mxu1 %v228_v36 }
  0xe2   :  { %v165_v38 = vpop.f32.mrb[5].mxu0  ;;  %662 = vmatpush3.bf16.msra.mxu1 %v228_v36  ;;  %v218_v40 = vmax.f32 %v651_v37, 0.0 }
  0xe3   :  { %v652_v39 = vpop.f32.mrb[6].mxu0  ;;  %663 = vmatprep.subr.bf16.mxu1 %v229_v35  ;;  %v216_v43 = vmax.f32 %v165_v38, 0.0 }
  0xe4   :  { %v219_v41 = vmax.f32 %v652_v39, 0.0  ;;  %v168_v42 = vpop.f32.mrb[7].mxu0 }
  0xe5   :  { %v217_v44 = vmax.f32 %v168_v42, 0.0  ;;  %v321_v42 = vpop.permute.xlu0 %320 }
  0xe6   :  { %v231_v45 = vpack.c.bf16 %v219_v41, %v218_v40  ;;  %664 = vmatpush3.bf16.msra.mxu1 %v229_v35 }
  0xe7   :  { %v230_v46 = vpack.c.bf16 %v217_v44, %v216_v43 }
  0xe9   :  { %v655_v47 = vpop.f32.mrb[8].mxu0  ;;  %665 = vmatprep.subr.bf16.mxu1 %v230_v46 }
  0xea   :  { %v181_v48 = vpop.f32.mrb[9].mxu0  ;;  %666 = vmatpush3.bf16.msra.mxu1 %v230_v46  ;;  %v222_v50 = vmax.f32 %v655_v47, 0.0  ;;  %v326_v46 = vpop.permute.xlu1 %325 }
  0xeb   :  { %v656_v49 = vpop.f32.mrb[10].mxu0  ;;  %667 = vmatprep.subr.bf16.mxu1 %v231_v45  ;;  %v220_v53 = vmax.f32 %v181_v48, 0.0 }
  0xec   :  { %v223_v51 = vmax.f32 %v656_v49, 0.0  ;;  %v184_v52 = vpop.f32.mrb[11].mxu0 }
  0xed   :  { %v221_v54 = vmax.f32 %v184_v52, 0.0 }
  0xee   :  { %v233_v55 = vpack.c.bf16 %v223_v51, %v222_v50  ;;  %668 = vmatpush3.bf16.msra.mxu1 %v231_v45 }
  0xef   :  { %v232_v56 = vpack.c.bf16 %v221_v54, %v220_v53  ;;  %v331_v54 = vpop.permute.xlu0 %330 }
  0xf1   :  { %v659_v57 = vpop.f32.mrb[12].mxu0  ;;  %669 = vmatprep.subr.bf16.mxu1 %v232_v56 }
  0xf2   :  { %v197_v58 = vpop.f32.mrb[13].mxu0  ;;  %670 = vmatpush3.bf16.msra.mxu1 %v232_v56  ;;  %v226_v60 = vmax.f32 %v659_v57, 0.0 }
  0xf3   :  { %v660_v59 = vpop.f32.mrb[14].mxu0  ;;  %671 = vmatprep.subr.bf16.mxu1 %v233_v55  ;;  %v224_v63 = vmax.f32 %v197_v58, 0.0 }
  0xf4   :  { %v227_v61 = vmax.f32 %v660_v59, 0.0  ;;  %v200_v62 = vpop.f32.mrb[15].mxu0  ;;  %v336_v59 = vpop.permute.xlu1 %335 }
  0xf5   :  { %v225_v0 = vmax.f32 %v200_v62, 0.0 }
  0xf6   :  { %v235_v1 = vpack.c.bf16 %v227_v61, %v226_v60  ;;  %672 = vmatpush3.bf16.msra.mxu1 %v233_v55 }
  0xf7   :  { %v234_v2 = vpack.c.bf16 %v225_v0, %v224_v63 }
  0xf9   :  { %673 = vmatprep.subr.bf16.mxu1 %v234_v2 }
  0xfa   :  { %674 = vmatpush3.bf16.msra.mxu1 %v234_v2  ;;  %v341_v2 = vpop.permute.xlu0 %340 }
  0xfb   :  { %675 = vmatprep.subr.bf16.mxu1 %v235_v1 }
  0xfe   :  { %676 = vmatpush3.bf16.msra.mxu1 %v235_v1 }
 0x101   :  { %678 = vmatmul.mubr.bf16.vlgmr.msra.gmra.mrb[0].mxu1 %v729_v3 }
 0x102   :  { %681 = vmatprep.mubr.bf16.mxu1 %v730_v4 }
 0x109   :  { %682 = vmatmul.mubr.bf16.gmra.mrb[4].mxu1 %v731_v5 }
 0x10a   :  { %685 = vmatprep.mubr.bf16.mxu1 %v732_v6 }
 0x111   :  { %686 = vmatmul.mubr.bf16.gmra.mrb[8].mxu1 %v733_v7  ;;  %v346_v7 = vpop.permute.xlu1 %345 }
 0x112   :  { %689 = vmatprep.mubr.bf16.mxu1 %v734_v8 }
 0x119   :  { %690 = vmatmul.mubr.bf16.gmra.mrb[12].mxu1 %v735_v9 }
 0x1d4   :  { %v679_v18 = vpop.f32.mrb[0].mxu1 }
 0x1d5   :  { %v439_v19 = vadd.f32 %v679_v18, %v281_v12  ;;  %v430_v20 = vpop.f32.mrb[1].mxu1 }
 0x1d6   :  { %v431_v22 = vadd.f32 %v430_v20, %v271_v11  ;;  %v680_v23 = vpop.f32.mrb[2].mxu1  ;;  %v736_v20 = vld [vmem:[%s937_s3] sm:$0xff]  }
 0x1d7   :  { %v442_v24 = vadd.f32 %v680_v23, %v286_v14  ;;  %v433_v25 = vpop.f32.mrb[3].mxu1  ;;  %v495_v27 = vmax.f32 %v439_v19, 0.0 }
 0x1d8   :  { %v434_v26 = vadd.f32 %v433_v25, %v276_v13  ;;  %v493_v30 = vmax.f32 %v431_v22, 0.0 }
 0x1d9   :  { %v496_v28 = vmax.f32 %v442_v24, 0.0 }
 0x1da   :  { %v494_v31 = vmax.f32 %v434_v26, 0.0 }
 0x1db   :  { %v510_v32 = vpack.c.bf16 %v496_v28, %v495_v27 }
 0x1dc   :  { %v509_v34 = vpack.c.bf16 %v494_v31, %v493_v30  ;;  %v683_v35 = vpop.f32.mrb[4].mxu1 }
 0x1dd   :  { %v455_v36 = vadd.f32 %v683_v35, %v301_v17  ;;  %v446_v37 = vpop.f32.mrb[5].mxu1 }
 0x1de   :  { %v447_v38 = vadd.f32 %v446_v37, %v291_v15  ;;  %v684_v39 = vpop.f32.mrb[6].mxu1  ;;  %694 = vmatpush3.bf16.msra.mxu0 %v509_v34 }
 0x1df   :  { %v458_v40 = vadd.f32 %v684_v39, %v306_v21  ;;  %v449_v41 = vpop.f32.mrb[7].mxu1  ;;  %695 = vmatprep.subr.bf16.mxu0 %v762_v10  ;;  %v499_v44 = vmax.f32 %v455_v36, 0.0  ;;  %v566_v21 = vstv %s939_s5 }
 0x1e0   :  { %v450_v43 = vadd.f32 %v449_v41, %v296_v16  ;;  %v497_v47 = vmax.f32 %v447_v38, 0.0 }
 0x1e1   :  { %v500_v45 = vmax.f32 %v458_v40, 0.0 }
 0x1e2   :  { %v498_v48 = vmax.f32 %v450_v43, 0.0  ;;  %696 = vmatpush3.bf16.msra.mxu0 %v510_v32 }
 0x1e3   :  { %v512_v49 = vpack.c.bf16 %v500_v45, %v499_v44  ;;  %697 = vmatprep.subr.bf16.mxu0 %v762_v10 }
 0x1e4   :  { %v511_v50 = vpack.c.bf16 %v498_v48, %v497_v47  ;;  %v687_v51 = vpop.f32.mrb[8].mxu1 }
 0x1e5   :  { %v471_v52 = vadd.f32 %v687_v51, %v321_v42  ;;  %v462_v53 = vpop.f32.mrb[9].mxu1 }
 0x1e6   :  { %v463_v55 = vadd.f32 %v462_v53, %v311_v29  ;;  %v688_v56 = vpop.f32.mrb[10].mxu1  ;;  %698 = vmatpush3.bf16.msra.mxu0 %v511_v50 }
 0x1e7   :  { %v474_v57 = vadd.f32 %v688_v56, %v326_v46  ;;  %v465_v58 = vpop.f32.mrb[11].mxu1  ;;  %699 = vmatprep.subr.bf16.mxu0 %v762_v10  ;;  %v503_v61 = vmax.f32 %v471_v52, 0.0 }
 0x1e8   :  { %v466_v60 = vadd.f32 %v465_v58, %v316_v33  ;;  %v501_v63 = vmax.f32 %v463_v55, 0.0 }
 0x1e9   :  { %v504_v62 = vmax.f32 %v474_v57, 0.0 }
 0x1ea   :  { %v502_v0 = vmax.f32 %v466_v60, 0.0  ;;  %700 = vmatpush3.bf16.msra.mxu0 %v512_v49 }
 0x1eb   :  { %v514_v1 = vpack.c.bf16 %v504_v62, %v503_v61  ;;  %701 = vmatprep.subr.bf16.mxu0 %v762_v10 }
 0x1ec   :  { %v513_v3 = vpack.c.bf16 %v502_v0, %v501_v63  ;;  %v691_v4 = vpop.f32.mrb[12].mxu1 }
 0x1ed   :  { %v487_v5 = vadd.f32 %v691_v4, %v341_v2  ;;  %v478_v6 = vpop.f32.mrb[13].mxu1 }
 0x1ee   :  { %v479_v8 = vadd.f32 %v478_v6, %v331_v54  ;;  %v692_v9 = vpop.f32.mrb[14].mxu1  ;;  %702 = vmatpush3.bf16.msra.mxu0 %v513_v3 }
 0x1ef   :  { %v490_v11 = vadd.f32 %v692_v9, %v346_v7  ;;  %v481_v12 = vpop.f32.mrb[15].mxu1  ;;  %703 = vmatprep.subr.bf16.mxu0 %v762_v10  ;;  %v507_v14 = vmax.f32 %v487_v5, 0.0 }
 0x1f0   :  { %v482_v13 = vadd.f32 %v481_v12, %v336_v59  ;;  %v505_v16 = vmax.f32 %v479_v8, 0.0 }
 0x1f1   :  { %v508_v15 = vmax.f32 %v490_v11, 0.0 }
 0x1f2   :  { %v506_v17 = vmax.f32 %v482_v13, 0.0  ;;  %704 = vmatpush3.bf16.msra.mxu0 %v514_v1 }
 0x1f3   :  { %v516_v18 = vpack.c.bf16 %v508_v15, %v507_v14  ;;  %705 = vmatprep.subr.bf16.mxu0 %v762_v10 }
 0x1f4   :  { %v515_v19 = vpack.c.bf16 %v506_v17, %v505_v16 }
 0x1f6   :  { %706 = vmatpush3.bf16.msra.mxu0 %v515_v19 }
 0x1f7   :  { %707 = vmatprep.subr.bf16.mxu0 %v762_v10 }
 0x1fa   :  { %708 = vmatpush3.bf16.msra.mxu0 %v516_v18 }
 0x1fd   :  { %710 = vmatmul.mubr.bf16.vlgmr.msra.gmra.mrb[16].mxu0 %v736_v20 }
 0x2d0   :  { %v559_v22 = vpop.f32.mrb[16].mxu0 }
 0x2d1   :  { %v567_v23 = vadd.f32 %v566_v21, %v559_v22  ;;  %v711_v24 = vpop.f32.mrb[17].mxu0 }
 0x2d2   :  { %v562_v25 = vpop.f32.mrb[18].mxu0 }
 0x2d3   :  { %568 = vst [vmem:[#allocation3] sm:$0x1] %v567_v23  ;;  %v712_v26 = vpop.f32.mrb[19].mxu0 }
 0x2d4   :  { %748 = shalt.err (!%p745_p4)
}
 0x2d5   :  { %s749_s5 = scalar_lea.hbm %s940_s6, 16 }
 0x2d6   :  { %p750_p5 = scmp.ne.s32.totalorder %s940_s6, %s749_s5  ;;  %p753_p6 = scmp.lt.u32.totalorder %s749_s5, %s940_s6 }
 0x2d8   :  { %p755_p7 = pnand %p753_p6, %p750_p5 }
 0x2da   :  { %758 = shalt.err (!%p755_p7)
}
 0x2db   :  { %578 = dma.vmem_to_hbm [thread:$0]  %s576_s13, 16, %s940_s6, [#allocation4]  }
 0x2dc   :  { %759 = dma.done.wait [#allocation4], 16  }
 0x2dd   :  { %760 = vsyncadd [#allocation4], 4294967280 }
 0x2de   :  { %582 = vsyncpa [#allocation4], 1 }

</bundles_post_ra>
